<compile_context>
chip_gen: v7x
topology: tpu7x:2x2x1
jax: 0.10.0
libtpu: 0.0.40
codegen_flags: <defaults>
</compile_context>

<pallas_src>
import math

import jax
import jax.numpy as jnp
import numpy as np
from jax import lax
from jax.experimental import pallas as pl
from jax.experimental.pallas import tpu as pltpu

MIN_NORM = 1e-15
MIN_SQ = MIN_NORM * MIN_NORM          # clamp on squared norms (f32-representable)
EPS_F32 = 4e-3                        # PoincareBall eps for float32


# ---------- manifold helpers (pure jnp; also used by the wrapper/ref) -------
def _artanh(x):
    # reference clamps to (-1+1e-15, 1-1e-15); use a float32-representable margin
    x = jnp.clip(x, -1.0 + 1e-7, 1.0 - 1e-7)
    return 0.5 * (jnp.log1p(x) - jnp.log1p(-x))


def _norm(x):
    return jnp.maximum(jnp.sqrt(jnp.sum(x * x, axis=-1, keepdims=True)), MIN_NORM)


def _proj(x, sqrt_c):
    norm = _norm(x)
    maxnorm = (1.0 - EPS_F32) / sqrt_c
    return jnp.where(norm > maxnorm, x / norm * maxnorm, x)


def _expmap0(u, sqrt_c):
    u_norm = _norm(u)
    return jnp.tanh(sqrt_c * u_norm) * u / (sqrt_c * u_norm)


def _logmap0(p, sqrt_c):
    p_norm = _norm(p)
    return _artanh(sqrt_c * p_norm) * p / (sqrt_c * p_norm)


def _mobius_add(x, y, c):
    x2 = jnp.sum(x * x, axis=-1, keepdims=True)
    y2 = jnp.sum(y * y, axis=-1, keepdims=True)
    xy = jnp.sum(x * y, axis=-1, keepdims=True)
    num = (1.0 + 2.0 * c * xy + c * y2) * x + (1.0 - c * x2) * y
    denom = 1.0 + 2.0 * c * xy + c * c * x2 * y2
    return num / jnp.maximum(denom, MIN_NORM)


# ------------------------------- kernel -------------------------------------
def make_hnn_kernel(c):
    c = float(c)
    sqrt_c = math.sqrt(c)
    inv_sqrt_c = 1.0 / sqrt_c
    maxnorm = (1.0 - EPS_F32) / sqrt_c

    def kernel(x_ref, wt_ref, hb_ref, o_ref):
        x = x_ref[...].astype(jnp.float32)        # (tm, Fin_p)
        wt = wt_ref[...].astype(jnp.float32)      # (Fin_p, Fout_p)
        hb = hb_ref[...].astype(jnp.float32)      # (1, Fout_p) = proj(expmap0(bias))

        # ---------------- mobius_matvec(W, x) followed by proj ----------------
        x_sq = jnp.sum(x * x, axis=-1, keepdims=True)              # reduce 1
        inv_xn = lax.rsqrt(jnp.maximum(x_sq, MIN_SQ))              # 1/||x||
        x_norm = x_sq * inv_xn                                     # ||x||

        mx = jnp.dot(x, wt, preferred_element_type=jnp.float32)    # MXU
        mx_sq = jnp.sum(mx * mx, axis=-1, keepdims=True)           # reduce 2
        inv_mxn = lax.rsqrt(jnp.maximum(mx_sq, MIN_SQ))            # 1/||mx||
        mx_norm = mx_sq * inv_mxn                                  # ||mx||

        t = jnp.tanh(mx_norm * inv_xn * _artanh(sqrt_c * x_norm))  # (tm,1)
        mv_norm = t * inv_sqrt_c                     # ||mobius_matvec|| (analytic)
        p1 = jnp.where(mv_norm > maxnorm,
                       maxnorm / jnp.maximum(mv_norm, MIN_NORM), 1.0)
        all_zero = mx_sq == 0.0                      # reuse mx_sq (no sum(|mx|))
        # res = proj(mobius_matvec(W, x))  ==  s_res * mx
        s_res = jnp.where(all_zero, 0.0, t * inv_mxn * inv_sqrt_c * p1)
        x2 = s_res * s_res * mx_sq                   # ||res||^2 (analytic)

        # --------------- mobius_add(res, hyp_bias) followed by proj -----------
        y2 = jnp.sum(hb * hb, axis=-1, keepdims=True)              # (1,1), tiny
        mxhb = jnp.sum(mx * hb, axis=-1, keepdims=True)            # reduce 3
        xy = s_res * mxhb                            # <res, hyp_bias>
        common = 1.0 + 2.0 * c * xy
        inv_d = 1.0 / jnp.maximum(common + (c * c) * x2 * y2, MIN_NORM)
        a = (common + c * y2) * inv_d                # coefficient of res
        b = (1.0 - c * x2) * inv_d                   # coefficient of hyp_bias
        # add = a*res + b*hb ; its norm from row scalars only (no new reduce)
        add_sq = jnp.maximum(a * a * x2 + b * b * y2 + 2.0 * a * b * xy, 0.0)
        inv_an = lax.rsqrt(jnp.maximum(add_sq, MIN_SQ))
        add_norm = add_sq * inv_an
        p2 = jnp.where(add_norm > maxnorm, maxnorm * inv_an, 1.0)
        r2n = jnp.maximum(p2 * add_norm, MIN_NORM)   # ||proj(mobius_add(...))||

        # --------------- HypAct: proj(expmap0(relu(logmap0(.)))) --------------
        g = _artanh(sqrt_c * r2n) / (sqrt_c * r2n)   # logmap0 row scale
        ca = g * p2 * a * s_res                      # logmap0(res2) = ca*mx + cb*hb
        cb = g * p2 * b
        xt = jnp.maximum(ca * mx + cb * hb, 0.0)     # ReLU, (tm, Fout_p)

        xt_sq = jnp.sum(xt * xt, axis=-1, keepdims=True)           # reduce 4
        inv_xtn = lax.rsqrt(jnp.maximum(xt_sq, MIN_SQ))
        xt_norm = xt_sq * inv_xtn
        te = jnp.tanh(sqrt_c * xt_norm)
        e_norm = te * inv_sqrt_c                     # ||expmap0(xt)|| (analytic)
        p3 = jnp.where(e_norm > maxnorm,
                       maxnorm / jnp.maximum(e_norm, MIN_NORM), 1.0)
        s_out = te * inv_xtn * inv_sqrt_c * p3
        o_ref[...] = (s_out * xt).astype(o_ref.dtype)

    return kernel


def _round_up(v, m):
    return ((v + m - 1) // m) * m


def hnn_forward(x, weight, bias, c, *, tm=512):
    """HNNLayer forward.  x: (N, F_in), weight: (F_out, F_in), bias: (F_out,)."""
    N, f_in = x.shape
    f_out = weight.shape[0]
    sqrt_c = math.sqrt(float(c))

    # Hoisted loop-invariant hyperbolic bias (proj_tan0 is identity on the ball).
    hb = _proj(_expmap0(bias.reshape(1, f_out).astype(jnp.float32), sqrt_c), sqrt_c)

    # Lane-dense feature padding (multiples of 128) and row tiling.
    f_in_p = _round_up(f_in, 128)
    f_out_p = _round_up(f_out, 128)
    tm = max(8, min(tm, _round_up(N, 8)))
    n_p = _round_up(N, tm)

    x_p = jnp.zeros((n_p, f_in_p), jnp.float32).at[:N, :f_in].set(
        x.astype(jnp.float32))
    wt_p = jnp.zeros((f_in_p, f_out_p), jnp.float32).at[:f_in, :f_out].set(
        weight.T.astype(jnp.float32))
    hb_p = jnp.zeros((1, f_out_p), jnp.float32).at[:, :f_out].set(hb)

    out_p = pl.pallas_call(
        make_hnn_kernel(c),
        out_shape=jax.ShapeDtypeStruct((n_p, f_out_p), x.dtype),
        grid_spec=pltpu.PrefetchScalarGridSpec(
            num_scalar_prefetch=0,
            grid=(n_p // tm,),
            in_specs=[
                pl.BlockSpec((tm, f_in_p), lambda i: (i, 0)),
                pl.BlockSpec((f_in_p, f_out_p), lambda i: (0, 0)),
                pl.BlockSpec((1, f_out_p), lambda i: (0, 0)),
            ],
            out_specs=pl.BlockSpec((tm, f_out_p), lambda i: (i, 0)),
        ),
        compiler_params=pltpu.CompilerParams(dimension_semantics=("parallel",)),
    )(x_p, wt_p, hb_p)
    return out_p[:N, :f_out]


# --------------------------- plain-JAX reference ----------------------------
def hnn_reference(x, weight, bias, c):
    sqrt_c = math.sqrt(c)
    x_norm = _norm(x)
    mx = x @ weight.T
    mx_norm = _norm(mx)
    res_c = (jnp.tanh(mx_norm / x_norm * _artanh(sqrt_c * x_norm))
             * mx / (mx_norm * sqrt_c))
    all_zero = jnp.sum(jnp.abs(mx), axis=-1, keepdims=True) == 0.0
    res = _proj(jnp.where(all_zero, 0.0, res_c), sqrt_c)
    hyp_bias = _proj(_expmap0(bias.reshape(1, -1), sqrt_c), sqrt_c)
    res = _proj(_mobius_add(res, hyp_bias, c), sqrt_c)
    xt = jnp.maximum(_logmap0(res, sqrt_c), 0.0)
    return _proj(_expmap0(xt, sqrt_c), sqrt_c)


if __name__ == "__main__":
    C = 1.0
    key = jax.random.PRNGKey(0)
    k_x, k_w, k_b, k_x2, k_w2, k_b2 = jax.random.split(key, 6)

    # ----- config 1: N=16, 32 -> 32 -----
    N, F_IN, F_OUT = 16, 32, 32
    bound = math.sqrt(2.0) * math.sqrt(6.0 / (F_IN + F_OUT))   # xavier_uniform(gain=sqrt(2))
    weight = jax.random.uniform(k_w, (F_OUT, F_IN), jnp.float32, -bound, bound)
    # HypLinear initializes bias to 0; use a small nonzero bias so the
    # mobius_add bias path is actually exercised.
    bias = 0.05 * jax.random.normal(k_b, (F_OUT,), jnp.float32)
    x_tan = 0.2 * jax.random.normal(k_x, (N, F_IN), jnp.float32)
    x = _proj(_expmap0(x_tan, math.sqrt(C)), math.sqrt(C))

    out = jax.block_until_ready(hnn_forward(x, weight, bias, C))
    ref = hnn_reference(x, weight, bias, C)
    np.testing.assert_allclose(np.asarray(out), np.asarray(ref), rtol=2e-4, atol=1e-5)

    # ----- config 2: ragged shapes (padding + multi-step grid) -----
    N2, F_IN2, F_OUT2 = 40, 24, 40
    bound2 = math.sqrt(2.0) * math.sqrt(6.0 / (F_IN2 + F_OUT2))
    weight2 = jax.random.uniform(k_w2, (F_OUT2, F_IN2), jnp.float32, -bound2, bound2)
    bias2 = 0.05 * jax.random.normal(k_b2, (F_OUT2,), jnp.float32)
    x_tan2 = 0.2 * jax.random.normal(k_x2, (N2, F_IN2), jnp.float32)
    x2 = _proj(_expmap0(x_tan2, math.sqrt(C)), math.sqrt(C))

    out2 = jax.block_until_ready(hnn_forward(x2, weight2, bias2, C, tm=16))
    ref2 = hnn_reference(x2, weight2, bias2, C)
    np.testing.assert_allclose(np.asarray(out2), np.asarray(ref2), rtol=2e-4, atol=1e-5)

    print("KERNEL_OK")
</pallas_src>

<mosaic_0001>
module attributes {stable_mosaic.version = 11 : i64} {
  func.func @kernel(%arg0: i32, %arg1: memref<16x128xf32, #tpu.memory_space<vmem>>, %arg2: memref<128x128xf32, #tpu.memory_space<vmem>>, %arg3: memref<1x128xf32, #tpu.memory_space<vmem>>, %arg4: memref<16x128xf32, #tpu.memory_space<vmem>>) attributes {dimension_semantics = [#tpu.dimension_semantics<parallel>], iteration_bounds = array<i64: 1>, scalar_prefetch = 0 : i64, scratch_operands = 0 : i64, tpu.core_type = #tpu.core_type<tc>, window_params = [{transform_indices = @transform_0, window_bounds = array<i64: 16, 128>}, {pipeline_mode = #tpu.pipeline_mode<synchronous>, transform_indices = @transform_1, window_bounds = array<i64: 128, 128>}, {pipeline_mode = #tpu.pipeline_mode<synchronous>, transform_indices = @transform_2, window_bounds = array<i64: 1, 128>}, {transform_indices = @transform_3, window_bounds = array<i64: 16, 128>}]} {
    %c0 = arith.constant 0 : index
    %c0_0 = arith.constant 0 : index
    %0 = vector.load %arg1[%c0, %c0_0] : memref<16x128xf32, #tpu.memory_space<vmem>>, vector<16x128xf32>
    %c0_1 = arith.constant 0 : index
    %c0_2 = arith.constant 0 : index
    %1 = vector.load %arg2[%c0_1, %c0_2] : memref<128x128xf32, #tpu.memory_space<vmem>>, vector<128x128xf32>
    %c0_3 = arith.constant 0 : index
    %c0_4 = arith.constant 0 : index
    %2 = vector.load %arg3[%c0_3, %c0_4] : memref<1x128xf32, #tpu.memory_space<vmem>>, vector<1x128xf32>
    %3 = arith.mulf %0, %0 : vector<16x128xf32>
    %cst = arith.constant dense<0.000000e+00> : vector<16xf32>
    %4 = vector.multi_reduction <add>, %3, %cst [1] : vector<16x128xf32> to vector<16xf32>
    %5 = vector.shape_cast %4 : vector<16xf32> to vector<16x1xf32>
    %cst_5 = arith.constant 1.000000e-30 : f32
    %6 = vector.broadcast %cst_5 : f32 to vector<16x1xf32>
    %7 = arith.maximumf %5, %6 : vector<16x1xf32>
    %8 = math.rsqrt %7 : vector<16x1xf32>
    %9 = arith.mulf %5, %8 : vector<16x1xf32>
    %cst_6 = arith.constant dense<0.000000e+00> : vector<16x128xf32>
    %10 = tpu.matmul %0, %1, %cst_6 {dimension_numbers = #tpu.dot_dimension_numbers<[1], [0], [0], [1], [0, 0, 1, 1], [], []>} : vector<16x128xf32>, vector<128x128xf32>, vector<16x128xf32> -> vector<16x128xf32>
    %11 = arith.mulf %10, %10 : vector<16x128xf32>
    %cst_7 = arith.constant dense<0.000000e+00> : vector<16xf32>
    %12 = vector.multi_reduction <add>, %11, %cst_7 [1] : vector<16x128xf32> to vector<16xf32>
    %13 = vector.shape_cast %12 : vector<16xf32> to vector<16x1xf32>
    %cst_8 = arith.constant 1.000000e-30 : f32
    %14 = vector.broadcast %cst_8 : f32 to vector<16x1xf32>
    %15 = arith.maximumf %13, %14 : vector<16x1xf32>
    %16 = math.rsqrt %15 : vector<16x1xf32>
    %17 = arith.mulf %13, %16 : vector<16x1xf32>
    %18 = arith.mulf %17, %8 : vector<16x1xf32>
    %cst_9 = arith.constant 1.000000e+00 : f32
    %19 = vector.broadcast %cst_9 : f32 to vector<16x1xf32>
    %20 = arith.mulf %19, %9 : vector<16x1xf32>
    %cst_10 = arith.constant -0.99999988 : f32
    %cst_11 = arith.constant 0.99999988 : f32
    %21 = vector.broadcast %cst_10 : f32 to vector<16x1xf32>
    %22 = arith.maximumf %21, %20 : vector<16x1xf32>
    %23 = vector.broadcast %cst_11 : f32 to vector<16x1xf32>
    %24 = arith.minimumf %23, %22 : vector<16x1xf32>
    %25 = math.log1p %24 : vector<16x1xf32>
    %cst_12 = arith.constant 0.000000e+00 : f32
    %26 = vector.broadcast %cst_12 : f32 to vector<16x1xf32>
    %27 = arith.subf %26, %24 : vector<16x1xf32>
    %28 = math.log1p %27 : vector<16x1xf32>
    %29 = arith.subf %25, %28 : vector<16x1xf32>
    %cst_13 = arith.constant 5.000000e-01 : f32
    %30 = vector.broadcast %cst_13 : f32 to vector<16x1xf32>
    %31 = arith.mulf %30, %29 : vector<16x1xf32>
    %32 = arith.mulf %18, %31 : vector<16x1xf32>
    %33 = math.tanh %32 : vector<16x1xf32>
    %cst_14 = arith.constant 1.000000e+00 : f32
    %34 = vector.broadcast %cst_14 : f32 to vector<16x1xf32>
    %35 = arith.mulf %33, %34 : vector<16x1xf32>
    %cst_15 = arith.constant 0.995999991 : f32
    %36 = vector.broadcast %cst_15 : f32 to vector<16x1xf32>
    %37 = arith.cmpf ogt, %35, %36 : vector<16x1xf32>
    %cst_16 = arith.constant 1.000000e-15 : f32
    %38 = vector.broadcast %cst_16 : f32 to vector<16x1xf32>
    %39 = arith.maximumf %35, %38 : vector<16x1xf32>
    %cst_17 = arith.constant 0.995999991 : f32
    %40 = vector.broadcast %cst_17 : f32 to vector<16x1xf32>
    %41 = arith.divf %40, %39 : vector<16x1xf32>
    %cst_18 = arith.constant 1.000000e+00 : f32
    %42 = vector.broadcast %cst_18 : f32 to vector<16x1xf32>
    %43 = arith.select %37, %41, %42 : vector<16x1xi1>, vector<16x1xf32>
    %cst_19 = arith.constant 0.000000e+00 : f32
    %44 = vector.broadcast %cst_19 : f32 to vector<16x1xf32>
    %45 = arith.cmpf oeq, %13, %44 : vector<16x1xf32>
    %46 = arith.mulf %33, %16 : vector<16x1xf32>
    %cst_20 = arith.constant 1.000000e+00 : f32
    %47 = vector.broadcast %cst_20 : f32 to vector<16x1xf32>
    %48 = arith.mulf %46, %47 : vector<16x1xf32>
    %49 = arith.mulf %48, %43 : vector<16x1xf32>
    %cst_21 = arith.constant 0.000000e+00 : f32
    %50 = vector.broadcast %cst_21 : f32 to vector<16x1xf32>
    %51 = arith.select %45, %50, %49 : vector<16x1xi1>, vector<16x1xf32>
    %52 = arith.mulf %51, %51 : vector<16x1xf32>
    %53 = arith.mulf %52, %13 : vector<16x1xf32>
    %54 = arith.mulf %2, %2 : vector<1x128xf32>
    %cst_22 = arith.constant dense<0.000000e+00> : vector<1xf32>
    %55 = vector.multi_reduction <add>, %54, %cst_22 [1] : vector<1x128xf32> to vector<1xf32>
    %56 = vector.shape_cast %55 : vector<1xf32> to vector<1x1xf32>
    %57 = vector.broadcast %2 : vector<1x128xf32> to vector<16x128xf32>
    %58 = arith.mulf %10, %57 : vector<16x128xf32>
    %cst_23 = arith.constant dense<0.000000e+00> : vector<16xf32>
    %59 = vector.multi_reduction <add>, %58, %cst_23 [1] : vector<16x128xf32> to vector<16xf32>
    %60 = vector.shape_cast %59 : vector<16xf32> to vector<16x1xf32>
    %61 = arith.mulf %51, %60 : vector<16x1xf32>
    %cst_24 = arith.constant 2.000000e+00 : f32
    %62 = vector.broadcast %cst_24 : f32 to vector<16x1xf32>
    %63 = arith.mulf %62, %61 : vector<16x1xf32>
    %cst_25 = arith.constant 1.000000e+00 : f32
    %64 = vector.broadcast %cst_25 : f32 to vector<16x1xf32>
    %65 = arith.addf %64, %63 : vector<16x1xf32>
    %cst_26 = arith.constant 1.000000e+00 : f32
    %66 = vector.broadcast %cst_26 : f32 to vector<16x1xf32>
    %67 = arith.mulf %66, %53 : vector<16x1xf32>
    %68 = vector.broadcast %56 : vector<1x1xf32> to vector<16x1xf32>
    %69 = arith.mulf %67, %68 : vector<16x1xf32>
    %70 = arith.addf %65, %69 : vector<16x1xf32>
    %cst_27 = arith.constant 1.000000e-15 : f32
    %71 = vector.broadcast %cst_27 : f32 to vector<16x1xf32>
    %72 = arith.maximumf %70, %71 : vector<16x1xf32>
    %cst_28 = arith.constant 1.000000e+00 : f32
    %73 = vector.broadcast %cst_28 : f32 to vector<16x1xf32>
    %74 = arith.divf %73, %72 : vector<16x1xf32>
    %cst_29 = arith.constant 1.000000e+00 : f32
    %75 = vector.broadcast %cst_29 : f32 to vector<1x1xf32>
    %76 = arith.mulf %75, %56 : vector<1x1xf32>
    %77 = vector.broadcast %76 : vector<1x1xf32> to vector<16x1xf32>
    %78 = arith.addf %65, %77 : vector<16x1xf32>
    %79 = arith.mulf %78, %74 : vector<16x1xf32>
    %cst_30 = arith.constant 1.000000e+00 : f32
    %80 = vector.broadcast %cst_30 : f32 to vector<16x1xf32>
    %81 = arith.mulf %80, %53 : vector<16x1xf32>
    %cst_31 = arith.constant 1.000000e+00 : f32
    %82 = vector.broadcast %cst_31 : f32 to vector<16x1xf32>
    %83 = arith.subf %82, %81 : vector<16x1xf32>
    %84 = arith.mulf %83, %74 : vector<16x1xf32>
    %85 = arith.mulf %79, %79 : vector<16x1xf32>
    %86 = arith.mulf %85, %53 : vector<16x1xf32>
    %87 = arith.mulf %84, %84 : vector<16x1xf32>
    %88 = vector.broadcast %56 : vector<1x1xf32> to vector<16x1xf32>
    %89 = arith.mulf %87, %88 : vector<16x1xf32>
    %90 = arith.addf %86, %89 : vector<16x1xf32>
    %cst_32 = arith.constant 2.000000e+00 : f32
    %91 = vector.broadcast %cst_32 : f32 to vector<16x1xf32>
    %92 = arith.mulf %91, %79 : vector<16x1xf32>
    %93 = arith.mulf %92, %84 : vector<16x1xf32>
    %94 = arith.mulf %93, %61 : vector<16x1xf32>
    %95 = arith.addf %90, %94 : vector<16x1xf32>
    %cst_33 = arith.constant 0.000000e+00 : f32
    %96 = vector.broadcast %cst_33 : f32 to vector<16x1xf32>
    %97 = arith.maximumf %95, %96 : vector<16x1xf32>
    %cst_34 = arith.constant 1.000000e-30 : f32
    %98 = vector.broadcast %cst_34 : f32 to vector<16x1xf32>
    %99 = arith.maximumf %97, %98 : vector<16x1xf32>
    %100 = math.rsqrt %99 : vector<16x1xf32>
    %101 = arith.mulf %97, %100 : vector<16x1xf32>
    %cst_35 = arith.constant 0.995999991 : f32
    %102 = vector.broadcast %cst_35 : f32 to vector<16x1xf32>
    %103 = arith.cmpf ogt, %101, %102 : vector<16x1xf32>
    %cst_36 = arith.constant 0.995999991 : f32
    %104 = vector.broadcast %cst_36 : f32 to vector<16x1xf32>
    %105 = arith.mulf %104, %100 : vector<16x1xf32>
    %cst_37 = arith.constant 1.000000e+00 : f32
    %106 = vector.broadcast %cst_37 : f32 to vector<16x1xf32>
    %107 = arith.select %103, %105, %106 : vector<16x1xi1>, vector<16x1xf32>
    %108 = arith.mulf %107, %101 : vector<16x1xf32>
    %cst_38 = arith.constant 1.000000e-15 : f32
    %109 = vector.broadcast %cst_38 : f32 to vector<16x1xf32>
    %110 = arith.maximumf %108, %109 : vector<16x1xf32>
    %cst_39 = arith.constant 1.000000e+00 : f32
    %111 = vector.broadcast %cst_39 : f32 to vector<16x1xf32>
    %112 = arith.mulf %111, %110 : vector<16x1xf32>
    %cst_40 = arith.constant -0.99999988 : f32
    %cst_41 = arith.constant 0.99999988 : f32
    %113 = vector.broadcast %cst_40 : f32 to vector<16x1xf32>
    %114 = arith.maximumf %113, %112 : vector<16x1xf32>
    %115 = vector.broadcast %cst_41 : f32 to vector<16x1xf32>
    %116 = arith.minimumf %115, %114 : vector<16x1xf32>
    %117 = math.log1p %116 : vector<16x1xf32>
    %cst_42 = arith.constant 0.000000e+00 : f32
    %118 = vector.broadcast %cst_42 : f32 to vector<16x1xf32>
    %119 = arith.subf %118, %116 : vector<16x1xf32>
    %120 = math.log1p %119 : vector<16x1xf32>
    %121 = arith.subf %117, %120 : vector<16x1xf32>
    %cst_43 = arith.constant 5.000000e-01 : f32
    %122 = vector.broadcast %cst_43 : f32 to vector<16x1xf32>
    %123 = arith.mulf %122, %121 : vector<16x1xf32>
    %cst_44 = arith.constant 1.000000e+00 : f32
    %124 = vector.broadcast %cst_44 : f32 to vector<16x1xf32>
    %125 = arith.mulf %124, %110 : vector<16x1xf32>
    %126 = arith.divf %123, %125 : vector<16x1xf32>
    %127 = arith.mulf %126, %107 : vector<16x1xf32>
    %128 = arith.mulf %127, %79 : vector<16x1xf32>
    %129 = arith.mulf %128, %51 : vector<16x1xf32>
    %130 = arith.mulf %126, %107 : vector<16x1xf32>
    %131 = arith.mulf %130, %84 : vector<16x1xf32>
    %132 = vector.broadcast %129 : vector<16x1xf32> to vector<16x128xf32>
    %133 = arith.mulf %132, %10 : vector<16x128xf32>
    %134 = vector.broadcast %131 : vector<16x1xf32> to vector<16x128xf32>
    %135 = vector.broadcast %2 : vector<1x128xf32> to vector<16x128xf32>
    %136 = arith.mulf %134, %135 : vector<16x128xf32>
    %137 = arith.addf %133, %136 : vector<16x128xf32>
    %cst_45 = arith.constant 0.000000e+00 : f32
    %138 = vector.broadcast %cst_45 : f32 to vector<16x128xf32>
    %139 = arith.maximumf %137, %138 : vector<16x128xf32>
    %140 = arith.mulf %139, %139 : vector<16x128xf32>
    %cst_46 = arith.constant dense<0.000000e+00> : vector<16xf32>
    %141 = vector.multi_reduction <add>, %140, %cst_46 [1] : vector<16x128xf32> to vector<16xf32>
    %142 = vector.shape_cast %141 : vector<16xf32> to vector<16x1xf32>
    %cst_47 = arith.constant 1.000000e-30 : f32
    %143 = vector.broadcast %cst_47 : f32 to vector<16x1xf32>
    %144 = arith.maximumf %142, %143 : vector<16x1xf32>
    %145 = math.rsqrt %144 : vector<16x1xf32>
    %146 = arith.mulf %142, %145 : vector<16x1xf32>
    %cst_48 = arith.constant 1.000000e+00 : f32
    %147 = vector.broadcast %cst_48 : f32 to vector<16x1xf32>
    %148 = arith.mulf %147, %146 : vector<16x1xf32>
    %149 = math.tanh %148 : vector<16x1xf32>
    %cst_49 = arith.constant 1.000000e+00 : f32
    %150 = vector.broadcast %cst_49 : f32 to vector<16x1xf32>
    %151 = arith.mulf %149, %150 : vector<16x1xf32>
    %cst_50 = arith.constant 0.995999991 : f32
    %152 = vector.broadcast %cst_50 : f32 to vector<16x1xf32>
    %153 = arith.cmpf ogt, %151, %152 : vector<16x1xf32>
    %cst_51 = arith.constant 1.000000e-15 : f32
    %154 = vector.broadcast %cst_51 : f32 to vector<16x1xf32>
    %155 = arith.maximumf %151, %154 : vector<16x1xf32>
    %cst_52 = arith.constant 0.995999991 : f32
    %156 = vector.broadcast %cst_52 : f32 to vector<16x1xf32>
    %157 = arith.divf %156, %155 : vector<16x1xf32>
    %cst_53 = arith.constant 1.000000e+00 : f32
    %158 = vector.broadcast %cst_53 : f32 to vector<16x1xf32>
    %159 = arith.select %153, %157, %158 : vector<16x1xi1>, vector<16x1xf32>
    %160 = arith.mulf %149, %145 : vector<16x1xf32>
    %cst_54 = arith.constant 1.000000e+00 : f32
    %161 = vector.broadcast %cst_54 : f32 to vector<16x1xf32>
    %162 = arith.mulf %160, %161 : vector<16x1xf32>
    %163 = arith.mulf %162, %159 : vector<16x1xf32>
    %164 = vector.broadcast %163 : vector<16x1xf32> to vector<16x128xf32>
    %165 = arith.mulf %164, %139 : vector<16x128xf32>
    %c0_55 = arith.constant 0 : index
    %c0_56 = arith.constant 0 : index
    %166 = vector.load %arg4[%c0_55, %c0_56] : memref<16x128xf32, #tpu.memory_space<vmem>>, vector<16x128xf32>
    tpu.vector_store %arg4[%c0_55, %c0_56], %165 {strides = array<i32>} : memref<16x128xf32, #tpu.memory_space<vmem>>, vector<16x128xf32>,
    return
  }
  func.func @transform_0(%arg0: i32) -> (i32, i32) {
    %c0_i32 = arith.constant 0 : i32
    %c0_i32_0 = arith.constant 0 : i32
    return %arg0, %c0_i32 : i32, i32
  }
  func.func @transform_1(%arg0: i32) -> (i32, i32) {
    %c0_i32 = arith.constant 0 : i32
    %c0_i32_0 = arith.constant 0 : i32
    %c0_i32_1 = arith.constant 0 : i32
    return %c0_i32, %c0_i32_0 : i32, i32
  }
  func.func @transform_2(%arg0: i32) -> (i32, i32) {
    %c0_i32 = arith.constant 0 : i32
    %c0_i32_0 = arith.constant 0 : i32
    %c0_i32_1 = arith.constant 0 : i32
    return %c0_i32, %c0_i32_0 : i32, i32
  }
  func.func @transform_3(%arg0: i32) -> (i32, i32) {
    %c0_i32 = arith.constant 0 : i32
    %c0_i32_0 = arith.constant 0 : i32
    return %arg0, %c0_i32 : i32, i32
  }
}

</mosaic_0001>

<bundles_post_ra>
// kernel: tpu_custom_call.1
= control target key start
LH: loop header
LB: loop body
LE: loop exit
PB: predicated region body
PF: predicated region fallthrough
CT: control target
= control target key end

     0   :  { %8 = vsyncpa [#allocation3], 0  ;;  %s806_s0 = inlined_call_operand.hbm [shape: f32[16,128], index: 0, kind: input, shape index: {}]   ;;  %s807_s1 = inlined_call_operand.hbm [shape: f32[128,128], index: 1, kind: input, shape index: {}]   ;;  %s808_s2 = inlined_call_operand.vmem [shape: f32[1,128], index: 2, kind: input, shape index: {}]   ;;  %s809_s3 = inlined_call_operand.hbm [shape: f32[16,128], index: 3, kind: output, shape index: {}]  }
   0x1   :  { %9 = vsyncpa [#allocation6], 0 }
   0x2   :  { %10 = vsyncpa [#allocation4], 0  ;;  %s654_s12 = smov [#allocation2]   ;;  %s582_s16 = scalar_lea.hbm %s806_s0, 256 }
   0x3   :  { %s16_s13 = sshll.u32 %s654_s12, 4  ;;  %p583_p0 = scmp.ne.s32.totalorder %s806_s0, %s582_s16  ;;  %s17_s13 = int_to_ptr.vmem [resolvable:$true] %s16_s13 }
   0x4   :  { %p586_p1 = scmp.lt.u32.totalorder %s582_s16, %s806_s0 }
   0x6   :  { %p588_p2 = pnand %p586_p1, %p583_p0 }
   0x8   :  { %591 = shalt.err (!%p588_p2)
}
   0x9   :  { %s592_s21 = scalar_lea.vmem %s17_s13, 256  ;;  %p597_p4 = scmp.lt.s32.totalorder %s17_s13, %s17_s13 }
   0xa   :  { %p593_p3 = scmp.ne.s32.totalorder %s17_s13, %s592_s21  ;;  %p598_p5 = scmp.lt.s32.totalorder %s592_s21, %s592_s21 }
   0xc   :  { %p599_p6 = por %p598_p5, %p597_p4 }
   0xe   :  { %p600_p7 = pnand %p599_p6, %p593_p3 }
  0x10   :  { %603 = shalt.err (!%p600_p7)
}
  0x11   :  { %s655_s22 = smov 128   ;;  %s656_s23 = smov 8  }
  0x12   :  { %22 = dma.hbm_to_vmem [thread:$0]  %s806_s0, 256, %s17_s13, [#allocation3], %s655_s22, %s655_s22, %s656_s23  }
  0x13   :  { %s657_s26 = smov [#allocation5]   ;;  %s604_s30 = scalar_lea.hbm %s807_s1, 2048 }
  0x14   :  { %s28_s27 = sshll.u32 %s657_s26, 4  ;;  %p605_p8 = scmp.ne.s32.totalorder %s807_s1, %s604_s30  ;;  %s29_s27 = int_to_ptr.vmem [resolvable:$true] %s28_s27 }
  0x15   :  { %p608_p9 = scmp.lt.u32.totalorder %s604_s30, %s807_s1 }
  0x17   :  { %p610_p10 = pnand %p608_p9, %p605_p8 }
  0x19   :  { %613 = shalt.err (!%p610_p10)
}
  0x1a   :  { %s614_s8 = scalar_lea.vmem %s29_s27, 2048  ;;  %p619_p12 = scmp.lt.s32.totalorder %s29_s27, %s29_s27 }
  0x1b   :  { %p615_p11 = scmp.ne.s32.totalorder %s29_s27, %s614_s8  ;;  %p620_p13 = scmp.lt.s32.totalorder %s614_s8, %s614_s8 }
  0x1d   :  { %p621_p0 = por %p620_p13, %p619_p12 }
  0x1f   :  { %p622_p1 = pnand %p621_p0, %p615_p11 }
  0x21   :  { %625 = shalt.err (!%p622_p1)
}
  0x22   :  { %34 = dma.hbm_to_vmem [thread:$0]  %s807_s1, 2048, %s29_s27, [#allocation6], %s655_s22, %s655_s22, %s656_s23  }
  0x23   :  { %648 = dma.done.wait [#allocation3], 256  }
  0x24   :  { %649 = vsyncadd [#allocation3], 4294967040 }
  0x25   :  { %650 = dma.done.wait [#allocation6], 2048  }
  0x26   :  { %651 = vsyncadd [#allocation6], 4294965248  ;;  %v45_v0 = vld [vmem:[#allocation5] sm:$0xff]  ;;  %v46_v1 = vld [vmem:[#allocation5 + $0x8] sm:$0xff]  ;;  %v241_v28 = vlaneseq  ;;  %vm236_vm0 = vcmask 1040384  }
  0x27   :  { %v47_v2 = vld [vmem:[#allocation5 + $0x10] sm:$0xff]  ;;  %v489_v3 = vpack.c.bf16 %v46_v1, %v45_v0  ;;  %v48_v4 = vld [vmem:[#allocation5 + $0x18] sm:$0xff]  ;;  %v49_v6 = vld [vmem:[#allocation5 + $0x20] sm:$0xff] }
  0x28   :  { %v493_v5 = vpack.c.bf16 %v48_v4, %v47_v2  ;;  %v50_v7 = vld [vmem:[#allocation5 + $0x28] sm:$0xff]  ;;  %v43_v9 = vld [vmem:[#allocation2] sm:$0xff]  ;;  %v52_v11 = vld [vmem:[#allocation5 + $0x38] sm:$0xff]  ;;  %v709_v29 = vshrl.u32 %v241_v28, 7 }
  0x29   :  { %490 = vmatprep.subr.bf16.mxu0 %v489_v3  ;;  %v497_v8 = vpack.c.bf16 %v50_v7, %v49_v6  ;;  %v51_v10 = vld [vmem:[#allocation5 + $0x30] sm:$0xff]  ;;  %486 = vmatprep.mubr.f32.mxu0 %v43_v9  ;;  %v62_v12 = vmul.f32 %v43_v9, %v43_v9  ;;  %v44_v13 = vld [vmem:[#allocation2 + $0x8] sm:$0xff]  ;;  %v53_v16 = vld [vmem:[#allocation5 + $0x40] sm:$0xff] }
  0x2a   :  { %492 = vmatpush3.bf16.msra.mxu0 %v489_v3  ;;  %v63_v14 = vmul.f32 %v44_v13, %v44_v13  ;;  %v501_v15 = vpack.c.bf16 %v52_v11, %v51_v10  ;;  %v54_v17 = vld [vmem:[#allocation5 + $0x48] sm:$0xff]  ;;  %v55_v19 = vld [vmem:[#allocation5 + $0x50] sm:$0xff]  ;;  %v56_v20 = vld [vmem:[#allocation5 + $0x58] sm:$0xff]  ;;  %v243_v30 = vsub.s32 0, %v709_v29 }
  0x2b   :  { %494 = vmatprep.subr.bf16.mxu0 %v493_v5  ;;  %64 = vadd.xlane.f32.xlu0 %v62_v12  ;;  %v505_v18 = vpack.c.bf16 %v54_v17, %v53_v16  ;;  %v509_v21 = vpack.c.bf16 %v56_v20, %v55_v19  ;;  %v57_v22 = vld [vmem:[#allocation5 + $0x60] sm:$0xff]  ;;  %v58_v23 = vld [vmem:[#allocation5 + $0x68] sm:$0xff]  ;;  %v59_v25 = vld [vmem:[#allocation5 + $0x70] sm:$0xff] }
  0x2c   :  { %v513_v24 = vpack.c.bf16 %v58_v23, %v57_v22  ;;  %v60_v26 = vld [vmem:[#allocation5 + $0x78] sm:$0xff]  ;;  %v61_v31 = vld [vmem:[%s808_s2] sm:$0x1]  ;;  %s658_s2 = smov [#allocation7]  }
  0x2d   :  { %v517_v27 = vpack.c.bf16 %v60_v26, %v59_v25  ;;  %v717_v32 = vrot.slane %v61_v31, %v243_v30  ;;  %v235_v35 = vmul.f32 %v61_v31, %v61_v31  ;;  %s419_s11 = sshll.u32 %s658_s2, 4  ;;  %s420_s11 = int_to_ptr.vmem [resolvable:$true] %s419_s11 }
  0x2e   :  { %496 = vmatpush3.bf16.msra.mxu0 %v493_v5  ;;  %s626_s12 = scalar_lea.vmem %s420_s11, 256  ;;  %p631_p3 = scmp.lt.s32.totalorder %s420_s11, %s420_s11 }
  0x2f   :  { %498 = vmatprep.subr.bf16.mxu0 %v497_v8  ;;  %66 = vadd.xlane.f32.xlu0 %v63_v14  ;;  %v237_v38 = vsel %vm236_vm0, %v235_v35, 0.0  ;;  %p627_p2 = scmp.ne.s32.totalorder %s420_s11, %s626_s12  ;;  %p632_p4 = scmp.lt.s32.totalorder %s626_s12, %s626_s12 }
  0x31   :  { %p633_p5 = por %p632_p4, %p631_p3 }
  0x32   :  { %500 = vmatpush3.bf16.msra.mxu0 %v497_v8 }
  0x33   :  { %502 = vmatprep.subr.bf16.mxu0 %v501_v15  ;;  %p634_p6 = pnand %p633_p5, %p627_p2 }
  0x36   :  { %504 = vmatpush3.bf16.msra.mxu0 %v501_v15 }
  0x37   :  { %506 = vmatprep.subr.bf16.mxu0 %v505_v18 }
  0x3a   :  { %508 = vmatpush3.bf16.msra.mxu0 %v505_v18 }
  0x3b   :  { %510 = vmatprep.subr.bf16.mxu0 %v509_v21 }
  0x3e   :  { %512 = vmatpush3.bf16.msra.mxu0 %v509_v21 }
  0x3f   :  { %514 = vmatprep.subr.bf16.mxu0 %v513_v24 }
  0x42   :  { %516 = vmatpush3.bf16.msra.mxu0 %v513_v24 }
  0x43   :  { %518 = vmatprep.subr.bf16.mxu0 %v517_v27 }
  0x46   :  { %520 = vmatpush3.bf16.msra.mxu0 %v517_v27 }
  0x49   :  { %487 = vmatmul.mubr.f32.vlgmr.msra.gmra.mrb[0].mxu0 %v44_v13 }
  0xb8   :  { %v65_v41 = vpop.xlane.xlu0 %64 }
  0xb9   :  { %v68_v42 = vmax.f32 %v65_v41, 1e-30 }
  0xbb   :  { %526 = vrsqrt.f32 %v68_v42 }
  0xbc   :  { %v67_v43 = vpop.xlane.xlu0 %66 }
  0xbd   :  { %v69_v44 = vmax.f32 %v67_v43, 1e-30 }
  0xbf   :  { %528 = vrsqrt.f32 %v69_v44 }
  0xc5   :  { %v527_v45 = vpop.eup %526 }
  0xc6   :  { %v72_v46 = vmul.f32 %v527_v45, %v65_v41 }
  0xc8   :  { %v432_v48 = vclamps-f32 %v72_v46, 0.9999999 }
  0xc9   :  { %v529_v47 = vpop.eup %528 }
  0xca   :  { %v73_v49 = vmul.f32 %v529_v47, %v67_v43  ;;  %v185_v50 = vsub.f32 0.0, %v432_v48  ;;  %v167_v52 = vadd.f32 1.0, %v432_v48  ;;  %v170_v57 = vmul.f32 -0.5, %v432_v48 }
  0xcb   :  { %v173_v60 = vand.u32 2147483647, %v432_v48 }
  0xcc   :  { %v433_v51 = vclamps-f32 %v73_v49, 0.9999999  ;;  %v187_v54 = vadd.f32 1.0, %v185_v50  ;;  %530 = vlog2.f32 %v167_v52  ;;  %v190_v58 = vmul.f32 -0.5, %v185_v50 }
  0xcd   :  { %v171_v59 = vadd.f32 1.0, %v170_v57  ;;  %v193_v4 = vand.u32 2147483647, %v185_v50  ;;  %vm734_vm1 = vcmp.lt.f32.partialorder %v173_v60, 0.0004427343 }
  0xce   :  { %v186_v53 = vsub.f32 0.0, %v433_v51  ;;  %v176_v55 = vadd.f32 1.0, %v433_v51  ;;  %532 = vlog2.f32 %v187_v54  ;;  %v179_v61 = vmul.f32 -0.5, %v433_v51 }
  0xcf   :  { %v191_v1 = vadd.f32 1.0, %v190_v58  ;;  %v172_v5 = vmul.f32 %v432_v48, %v171_v59  ;;  %v182_v16 = vand.u32 2147483647, %v433_v51  ;;  %vm194_vm2 = vcmp.lt.f32.partialorder %v193_v4, 0.0004427343 }
  0xd0   :  { %v196_v56 = vadd.f32 1.0, %v186_v53  ;;  %534 = vlog2.f32 %v176_v55  ;;  %v199_v2 = vmul.f32 -0.5, %v186_v53  ;;  %v180_v7 = vadd.f32 1.0, %v179_v61 }
  0xd1   :  { %v192_v12 = vmul.f32 %v191_v1, %v185_v50  ;;  %v202_v17 = vand.u32 2147483647, %v186_v53  ;;  %vm183_vm3 = vcmp.lt.f32.partialorder %v182_v16, 0.0004427343 }
  0xd2   :  { %536 = vlog2.f32 %v196_v56  ;;  %v200_v14 = vadd.f32 1.0, %v199_v2  ;;  %v181_v18 = vmul.f32 %v433_v51, %v180_v7 }
  0xd3   :  { %vm203_vm4 = vcmp.lt.f32.partialorder %v202_v17, 0.0004427343 }
  0xd4   :  { %v201_v23 = vmul.f32 %v200_v14, %v186_v53 }
  0xd6   :  { %v531_v63 = vpop.eup %530 }
  0xd7   :  { %v169_v8 = vmul.f32 0.6931472, %v531_v63 }
  0xd8   :  { %v533_v3 = vpop.eup %532 }
  0xd9   :  { %v189_v11 = vmul.f32 0.6931472, %v533_v3  ;;  %v175_v19 = vsel %vm734_vm1, %v172_v5, %v169_v8 }
  0xda   :  { %v535_v10 = vpop.eup %534 }
  0xdb   :  { %v195_v20 = vsel %vm194_vm2, %v192_v12, %v189_v11  ;;  %v178_v21 = vmul.f32 0.6931472, %v535_v10 }
  0xdc   :  { %v537_v15 = vpop.eup %536  ;;  %v205_v24 = vsub.f32 %v175_v19, %v195_v20 }
  0xdd   :  { %v198_v22 = vmul.f32 0.6931472, %v537_v15  ;;  %v184_v26 = vsel %vm183_vm3, %v181_v18, %v178_v21 }
  0xde   :  { %v207_v35 = vmul.f32 0.5, %v205_v24 }
  0xdf   :  { %v204_v27 = vsel %vm203_vm4, %v201_v23, %v198_v22 }
 0x11c   :  { %v719_v33 = vpop.f32.mrb[0].mxu0 }
 0x11d   :  { %v721_v34 = vpop.f32.mrb[1].mxu0  ;;  %v150_v39 = vmul.f32 %v719_v33, %v719_v33  ;;  %v247_v40 = vmul.f32 %v719_v33, %v717_v32 }
 0x11e   :  { %v149_v36 = vmul.f32 %v721_v34, %v721_v34  ;;  %v246_v37 = vmul.f32 %v717_v32, %v721_v34 }
 0x120   :  { %151 = vadd.xlane.f32.xlu1 %v149_v36  ;;  %248 = vadd.xlane.f32.xlu0 %v246_v37  ;;  %v206_v36 = vsub.f32 %v184_v26, %v204_v27 }
 0x122   :  { %v208_v41 = vmul.f32 0.5, %v206_v36 }
 0x124   :  { %153 = vadd.xlane.f32.xlu1 %v150_v39  ;;  %238 = vadd.xlane.f32.xlu0 %v237_v38 }
 0x128   :  { %250 = vadd.xlane.f32.xlu1 %v247_v40 }
 0x1ad   :  { %v731_v62 = vpop.xlane.xlu1 %151 }
 0x1ae   :  { %v155_v0 = vmax.f32 %v731_v62, 1e-30  ;;  %vm223_vm6 = vcmp.eq.f32.partialorder %v731_v62, 0.0 }
 0x1b0   :  { %538 = vrsqrt.f32 %v155_v0 }
 0x1b1   :  { %v738_v9 = vpop.xlane.xlu1 %153 }
 0x1b2   :  { %v156_v13 = vmax.f32 %v738_v9, 1e-30  ;;  %vm224_vm8 = vcmp.eq.f32.partialorder %v738_v9, 0.0 }
 0x1b4   :  { %540 = vrsqrt.f32 %v156_v13 }
 0x1b5   :  { %v251_v2 = vpop.xlane.xlu1 %250 }
 0x1ba   :  { %v539_v25 = vpop.eup %538 }
 0x1bb   :  { %v159_v28 = vmul.f32 %v539_v25, %v731_v62 }
 0x1bd   :  { %v161_v31 = vmul.f32 %v527_v45, %v159_v28  ;;  %v249_v45 = vpop.xlane.xlu0 %248 }
 0x1be   :  { %v541_v37 = vpop.eup %540 }
 0x1bf   :  { %v209_v38 = vmul.f32 %v207_v35, %v161_v31  ;;  %v160_v39 = vmul.f32 %v541_v37, %v738_v9 }
 0x1c1   :  { %542 = vtanh.f32 %v209_v38  ;;  %v162_v40 = vmul.f32 %v529_v47, %v160_v39  ;;  %v239_v55 = vpop.xlane.xlu0 %238 }
 0x1c2   :  { %v261_v63 = vrot.slane %v239_v55, %v243_v30 }
 0x1c3   :  { %v210_v42 = vmul.f32 %v208_v41, %v162_v40 }
 0x1c5   :  { %544 = vtanh.f32 %v210_v42 }
 0x1cb   :  { %v543_v43 = vpop.eup %542 }
 0x1cc   :  { %v215_v44 = vmax.f32 %v543_v43, 1e-15  ;;  %vm213_vm5 = vcmp.gt.f32.partialorder %v543_v43, 0.996  ;;  %v225_v51 = vmul.f32 %v543_v43, %v539_v25 }
 0x1ce   :  { %546 = vrcp.f32 %v215_v44 }
 0x1cf   :  { %v545_v46 = vpop.eup %544 }
 0x1d0   :  { %v216_v48 = vmax.f32 %v545_v46, 1e-15  ;;  %vm214_vm7 = vcmp.gt.f32.partialorder %v545_v46, 0.996  ;;  %v226_v57 = vmul.f32 %v545_v46, %v541_v37 }
 0x1d2   :  { %548 = vrcp.f32 %v216_v48 }
 0x1d8   :  { %v547_v49 = vpop.eup %546 }
 0x1d9   :  { %v218_v50 = vmul.f32 0.996, %v547_v49 }
 0x1db   :  { %v221_v52 = vsel %vm213_vm5, %v218_v50, 1.0 }
 0x1dc   :  { %v549_v53 = vpop.eup %548  ;;  %v227_v54 = vmul.f32 %v225_v51, %v221_v52 }
 0x1dd   :  { %v220_v47 = vmul.f32 0.996, %v549_v53 }
 0x1de   :  { %v746_v56 = vsel %vm223_vm6, 0.0, %v227_v54 }
 0x1df   :  { %v231_v58 = vmul.f32 %v746_v56, %v746_v56  ;;  %v252_v59 = vmul.f32 %v249_v45, %v746_v56  ;;  %v222_v60 = vsel %vm214_vm7, %v220_v47, 1.0 }
 0x1e0   :  { %v228_v61 = vmul.f32 %v226_v57, %v222_v60 }
 0x1e1   :  { %v233_v0 = vmul.f32 %v231_v58, %v731_v62  ;;  %v254_v1 = vmul.f32 2.0, %v252_v59 }
 0x1e2   :  { %v755_v3 = vsel %vm224_vm8, 0.0, %v228_v61 }
 0x1e3   :  { %v256_v4 = vadd.f32 1.0, %v254_v1  ;;  %v232_v5 = vmul.f32 %v755_v3, %v755_v3  ;;  %v253_v6 = vmul.f32 %v251_v2, %v755_v3  ;;  %v262_v7 = vmul.f32 %v261_v63, %v233_v0 }
 0x1e4   :  { %v276_v14 = vsub.f32 1.0, %v233_v0 }
 0x1e5   :  { %v234_v8 = vmul.f32 %v232_v5, %v738_v9  ;;  %v255_v10 = vmul.f32 2.0, %v253_v6  ;;  %v264_v29 = vadd.f32 %v262_v7, %v256_v4  ;;  %v272_v15 = vadd.f32 %v261_v63, %v256_v4 }
 0x1e7   :  { %v257_v30 = vadd.f32 1.0, %v255_v10  ;;  %v263_v11 = vmul.f32 %v261_v63, %v234_v8  ;;  %v266_v62 = vmax.f32 %v264_v29, 1e-15  ;;  %v277_v19 = vsub.f32 1.0, %v234_v8 }
 0x1e9   :  { %v265_v12 = vadd.f32 %v263_v11, %v257_v30  ;;  %550 = vrcp.f32 %v266_v62  ;;  %v273_v20 = vadd.f32 %v261_v63, %v257_v30 }
 0x1eb   :  { %v267_v13 = vmax.f32 %v265_v12, 1e-15 }
 0x1ed   :  { %552 = vrcp.f32 %v267_v13 }
 0x1f3   :  { %v551_v16 = vpop.eup %550 }
 0x1f4   :  { %v761_v17 = vmul.f32 %v551_v16, %v272_v15  ;;  %v763_v18 = vmul.f32 %v551_v16, %v276_v14 }
 0x1f6   :  { %v280_v9 = vmul.f32 %v761_v17, %v761_v17  ;;  %v284_v22 = vmul.f32 %v763_v18, %v763_v18  ;;  %v290_v23 = vmul.f32 2.0, %v761_v17 }
 0x1f7   :  { %v553_v21 = vpop.eup %552 }
 0x1f8   :  { %v770_v24 = vmul.f32 %v553_v21, %v273_v20  ;;  %v772_v25 = vmul.f32 %v553_v21, %v277_v19  ;;  %v282_v26 = vmul.f32 %v280_v9, %v233_v0  ;;  %v286_v27 = vmul.f32 %v284_v22, %v261_v63 }
 0x1f9   :  { %v292_v28 = vmul.f32 %v290_v23, %v763_v18 }
 0x1fa   :  { %v281_v31 = vmul.f32 %v770_v24, %v770_v24  ;;  %v285_v35 = vmul.f32 %v772_v25, %v772_v25  ;;  %v291_v36 = vmul.f32 2.0, %v770_v24  ;;  %v288_v37 = vadd.f32 %v286_v27, %v282_v26 }
 0x1fb   :  { %v294_v38 = vmul.f32 %v292_v28, %v252_v59 }
 0x1fc   :  { %v283_v39 = vmul.f32 %v281_v31, %v234_v8  ;;  %v287_v40 = vmul.f32 %v285_v35, %v261_v63  ;;  %v293_v41 = vmul.f32 %v291_v36, %v772_v25 }
 0x1fd   :  { %v296_v42 = vadd.f32 %v294_v38, %v288_v37 }
 0x1fe   :  { %v289_v43 = vadd.f32 %v287_v40, %v283_v39  ;;  %v295_v44 = vmul.f32 %v293_v41, %v253_v6 }
 0x1ff   :  { %v298_v46 = vmax.f32 %v296_v42, 0.0 }
 0x200   :  { %v297_v48 = vadd.f32 %v295_v44, %v289_v43 }
 0x201   :  { %v300_v49 = vmax.f32 %v298_v46, 1e-30 }
 0x202   :  { %v299_v50 = vmax.f32 %v297_v48, 0.0 }
 0x203   :  { %554 = vrsqrt.f32 %v300_v49 }
 0x204   :  { %v301_v45 = vmax.f32 %v299_v50, 1e-30 }
 0x206   :  { %556 = vrsqrt.f32 %v301_v45 }
 0x20d   :  { %v555_v51 = vpop.eup %554 }
 0x20e   :  { %v304_v52 = vmul.f32 %v555_v51, %v298_v46  ;;  %v308_v53 = vmul.f32 0.996, %v555_v51 }
 0x210   :  { %v557_v54 = vpop.eup %556  ;;  %vm306_vm9 = vcmp.gt.f32.partialorder %v304_v52, 0.996 }
 0x211   :  { %v310_v47 = vsel %vm306_vm9, %v308_v53, 1.0  ;;  %v305_v55 = vmul.f32 %v557_v54, %v299_v50  ;;  %v309_v57 = vmul.f32 0.996, %v557_v54 }
 0x212   :  { %v312_v58 = vmul.f32 %v310_v47, %v304_v52 }
 0x213   :  { %vm307_vm10 = vcmp.gt.f32.partialorder %v305_v55, 0.996 }
 0x214   :  { %v314_v59 = vmax.f32 %v312_v58, 1e-15  ;;  %v311_v60 = vsel %vm307_vm10, %v309_v57, 1.0 }
 0x215   :  { %v313_v61 = vmul.f32 %v311_v60, %v305_v55 }
 0x216   :  { %v434_v63 = vclamps-f32 %v314_v59, 0.9999999 }
 0x217   :  { %v315_v0 = vmax.f32 %v313_v61, 1e-15 }
 0x218   :  { %v320_v1 = vadd.f32 1.0, %v434_v63  ;;  %v338_v2 = vsub.f32 0.0, %v434_v63  ;;  %v323_v8 = vmul.f32 -0.5, %v434_v63  ;;  %v326_v11 = vand.u32 2147483647, %v434_v63 }
 0x219   :  { %v435_v4 = vclamps-f32 %v315_v0, 0.9999999 }
 0x21a   :  { %558 = vlog2.f32 %v320_v1  ;;  %v340_v5 = vadd.f32 1.0, %v338_v2  ;;  %v343_v29 = vmul.f32 -0.5, %v338_v2  ;;  %v324_v30 = vadd.f32 1.0, %v323_v8 }
 0x21b   :  { %v329_v6 = vadd.f32 1.0, %v435_v4  ;;  %v339_v7 = vsub.f32 0.0, %v435_v4  ;;  %v332_v12 = vmul.f32 -0.5, %v435_v4  ;;  %v346_v15 = vand.u32 2147483647, %v338_v2 }
 0x21c   :  { %560 = vlog2.f32 %v340_v5  ;;  %v344_v62 = vadd.f32 1.0, %v343_v29  ;;  %v325_v20 = vmul.f32 %v434_v63, %v324_v30  ;;  %vm327_vm11 = vcmp.lt.f32.partialorder %v326_v11, 0.0004427343 }
 0x21d   :  { %562 = vlog2.f32 %v329_v6  ;;  %v349_v10 = vadd.f32 1.0, %v339_v7  ;;  %v352_v13 = vmul.f32 -0.5, %v339_v7  ;;  %v333_v23 = vadd.f32 1.0, %v332_v12 }
 0x21e   :  { %v345_v22 = vmul.f32 %v344_v62, %v338_v2  ;;  %vm347_vm12 = vcmp.lt.f32.partialorder %v346_v15, 0.0004427343  ;;  %v335_v27 = vand.u32 2147483647, %v435_v4  ;;  %v355_v28 = vand.u32 2147483647, %v339_v7 }
 0x21f   :  { %564 = vlog2.f32 %v349_v10  ;;  %v353_v26 = vadd.f32 1.0, %v352_v13  ;;  %v334_v39 = vmul.f32 %v435_v4, %v333_v23 }
 0x220   :  { %566 = vrcp.f32 %v314_v59  ;;  %vm336_vm13 = vcmp.lt.f32.partialorder %v335_v27, 0.0004427343  ;;  %vm356_vm14 = vcmp.lt.f32.partialorder %v355_v28, 0.0004427343 }
 0x221   :  { %568 = vrcp.f32 %v315_v0  ;;  %v354_v41 = vmul.f32 %v353_v26, %v339_v7 }
 0x224   :  { %v559_v14 = vpop.eup %558 }
 0x225   :  { %v322_v16 = vmul.f32 0.6931472, %v559_v14 }
 0x226   :  { %v561_v19 = vpop.eup %560 }
 0x227   :  { %v563_v21 = vpop.eup %562  ;;  %v342_v9 = vmul.f32 0.6931472, %v561_v19  ;;  %v328_v31 = vsel %vm327_vm11, %v325_v20, %v322_v16 }
 0x228   :  { %v331_v36 = vmul.f32 0.6931472, %v563_v21 }
 0x229   :  { %v348_v35 = vsel %vm347_vm12, %v345_v22, %v342_v9  ;;  %v565_v37 = vpop.eup %564 }
 0x22a   :  { %v358_v38 = vsub.f32 %v328_v31, %v348_v35  ;;  %v351_v40 = vmul.f32 0.6931472, %v565_v37  ;;  %v567_v43 = vpop.eup %566  ;;  %v337_v44 = vsel %vm336_vm13, %v334_v39, %v331_v36 }
 0x22b   :  { %v569_v50 = vpop.eup %568 }
 0x22c   :  { %v360_v42 = vmul.f32 0.5, %v358_v38  ;;  %v357_v46 = vsel %vm356_vm14, %v354_v41, %v351_v40 }
 0x22d   :  { %v359_v49 = vsub.f32 %v337_v44, %v357_v46 }
 0x22e   :  { %v363_v48 = vmul.f32 %v567_v43, %v360_v42 }
 0x22f   :  { %v361_v51 = vmul.f32 0.5, %v359_v49 }
 0x230   :  { %v366_v45 = vmul.f32 %v363_v48, %v310_v47 }
 0x231   :  { %v365_v54 = vmul.f32 %v569_v50, %v361_v51 }
 0x232   :  { %v368_v52 = vmul.f32 %v366_v45, %v761_v17  ;;  %v372_v53 = vmul.f32 %v366_v45, %v763_v18 }
 0x233   :  { %v367_v57 = vmul.f32 %v365_v54, %v311_v60 }
 0x234   :  { %v370_v55 = vmul.f32 %v368_v52, %v746_v56  ;;  %v376_v59 = vmul.f32 %v372_v53, %v717_v32 }
 0x235   :  { %v369_v61 = vmul.f32 %v367_v57, %v770_v24  ;;  %v373_v63 = vmul.f32 %v367_v57, %v772_v25 }
 0x236   :  { %v374_v58 = vmul.f32 %v370_v55, %v721_v34 }
 0x237   :  { %v371_v47 = vmul.f32 %v369_v61, %v755_v3  ;;  %v377_v18 = vmul.f32 %v373_v63, %v717_v32 }
 0x238   :  { %v378_v0 = vadd.f32 %v376_v59, %v374_v58 }
 0x239   :  { %v375_v17 = vmul.f32 %v719_v33, %v371_v47 }
 0x23a   :  { %v380_v1 = vmax.f32 %v378_v0, 0.0 }
 0x23b   :  { %v379_v4 = vadd.f32 %v377_v18, %v375_v17 }
 0x23c   :  { %v382_v2 = vmul.f32 %v380_v1, %v380_v1 }
 0x23d   :  { %v381_v56 = vmax.f32 %v379_v4, 0.0 }
 0x23e   :  { %384 = vadd.xlane.f32.xlu1 %v382_v2 }
 0x23f   :  { %v383_v60 = vmul.f32 %v381_v56, %v381_v56 }
 0x241   :  { %386 = vadd.xlane.f32.xlu0 %v383_v60 }
 0x2cb   :  { %v385_v34 = vpop.xlane.xlu1 %384 }
 0x2cc   :  { %v388_v5 = vmax.f32 %v385_v34, 1e-30 }
 0x2ce   :  { %570 = vrsqrt.f32 %v388_v5  ;;  %v387_v24 = vpop.xlane.xlu0 %386 }
 0x2cf   :  { %v389_v6 = vmax.f32 %v387_v24, 1e-30 }
 0x2d1   :  { %572 = vrsqrt.f32 %v389_v6 }
 0x2d8   :  { %v571_v25 = vpop.eup %570 }
 0x2d9   :  { %v392_v7 = vmul.f32 %v571_v25, %v385_v34 }
 0x2db   :  { %574 = vtanh.f32 %v392_v7  ;;  %v573_v3 = vpop.eup %572 }
 0x2dc   :  { %v393_v8 = vmul.f32 %v573_v3, %v387_v24 }
 0x2de   :  { %576 = vtanh.f32 %v393_v8 }
 0x2e5   :  { %v575_v33 = vpop.eup %574 }
 0x2e6   :  { %v398_v32 = vmax.f32 %v575_v33, 1e-15  ;;  %vm396_vm15 = vcmp.gt.f32.partialorder %v575_v33, 0.996  ;;  %v406_v62 = vmul.f32 %v575_v33, %v571_v25 }
 0x2e8   :  { %578 = vrcp.f32 %v398_v32  ;;  %v577_v10 = vpop.eup %576 }
 0x2e9   :  { %v399_v29 = vmax.f32 %v577_v10, 1e-15  ;;  %vm397_vm0 = vcmp.gt.f32.partialorder %v577_v10, 0.996  ;;  %v407_v16 = vmul.f32 %v577_v10, %v573_v3 }
 0x2eb   :  { %580 = vrcp.f32 %v399_v29 }
 0x2f2   :  { %v579_v30 = vpop.eup %578 }
 0x2f3   :  { %v401_v11 = vmul.f32 0.996, %v579_v30 }
 0x2f5   :  { %v404_v12 = vsel %vm396_vm15, %v401_v11, 1.0  ;;  %v581_v13 = vpop.eup %580 }
 0x2f6   :  { %v408_v14 = vmul.f32 %v406_v62, %v404_v12  ;;  %v403_v15 = vmul.f32 0.996, %v581_v13 }
 0x2f8   :  { %v410_v19 = vmul.f32 %v408_v14, %v380_v1  ;;  %v405_v20 = vsel %vm397_vm0, %v403_v15, 1.0 }
 0x2f9   :  { %v409_v21 = vmul.f32 %v407_v16, %v405_v20 }
 0x2fa   :  { %412 = vst [vmem:[#allocation7] sm:$0xff] %v410_v19 }
 0x2fb   :  { %v411_v9 = vmul.f32 %v409_v21, %v381_v56 }
 0x2fd   :  { %413 = vst [vmem:[#allocation7 + $0x8] sm:$0xff] %v411_v9 }
 0x2fe   :  { %637 = shalt.err (!%p634_p6)
}
 0x2ff   :  { %s638_s15 = scalar_lea.hbm %s809_s3, 256 }
 0x300   :  { %p639_p7 = scmp.ne.s32.totalorder %s809_s3, %s638_s15  ;;  %p642_p8 = scmp.lt.u32.totalorder %s638_s15, %s809_s3 }
 0x302   :  { %p644_p9 = pnand %p642_p8, %p639_p7 }
 0x304   :  { %647 = shalt.err (!%p644_p9)
}
 0x305   :  { %425 = dma.vmem_to_hbm [thread:$0]  %s420_s11, 256, %s809_s3, [#allocation4], %s655_s22, %s655_s22, %s656_s23  }
 0x306   :  { %652 = dma.done.wait [#allocation4], 256  }
 0x307   :  { %653 = vsyncadd [#allocation4], 4294967040 }
 0x308   :  { %429 = vsyncpa [#allocation3], 1 }
 0x309   :  { %430 = vsyncpa [#allocation6], 1 }
 0x30a   :  { %431 = vsyncpa [#allocation4], 1 }

</bundles_post_ra>
